<compile_context>
chip_gen: v7x
topology: tpu7x:2x2x1
jax: 0.10.0
libtpu: 0.0.40
codegen_flags: <defaults>
</compile_context>

<pallas_src>
import functools

import jax
import jax.numpy as jnp
import numpy as np
from jax import lax
from jax.experimental import pallas as pl
from jax.experimental.pallas import tpu as pltpu


def _round_up(a: int, b: int) -> int:
    return (a + b - 1) // b * b


def _cdiv(a: int, b: int) -> int:
    return (a + b - 1) // b


def _vmem_capacity_bytes() -> int:
    """Best-effort VMEM capacity query; conservative (v7x-sized) fallback."""
    try:
        info = pltpu.get_tpu_info()
        cap = int(getattr(info, "vmem_capacity_bytes", 0))
        if cap > 0:
            return cap
    except Exception:
        pass
    return 64 << 20


def _l1_rowsum_kernel(x_ref, y_ref, rs_ref, *, R, HW, ROW_BLK, HW_BLK, n_hw):
    # x_ref, y_ref: (ROW_BLK, HW_BLK) tiles (native dtype, upcast here)
    # rs_ref:       (1, ROW_BLK) lane-dense per-row partial sums of |x - y| (f32)
    i = pl.program_id(0)

    x = x_ref[...].astype(jnp.float32)
    y = y_ref[...].astype(jnp.float32)
    diff = jnp.abs(x - y)

    if HW % HW_BLK != 0:
        # Trailing H*W block reads past the array: zero the garbage lanes.
        j = pl.program_id(1)
        col = lax.broadcasted_iota(jnp.int32, diff.shape, 1) + j * HW_BLK
        diff = jnp.where(col < HW, diff, 0.0)

    # Lane-dense partial: per-row sum relayouted across lanes.
    partial = jnp.sum(diff, axis=1)[None, :]          # (1, ROW_BLK)

    if R % ROW_BLK != 0:
        # Trailing row block reads past the array: zero the garbage rows.
        row = lax.broadcasted_iota(jnp.int32, partial.shape, 1) + i * ROW_BLK
        partial = jnp.where(row < R, partial, 0.0)

    if n_hw == 1:
        rs_ref[...] = partial
    else:
        @pl.when(pl.program_id(1) == 0)
        def _init():
            rs_ref[...] = jnp.zeros_like(rs_ref)

        rs_ref[...] += partial


def l1_loss_pallas(inp, out, denorm, *, tile_budget_bytes=None):
    """Equivalent of the PyTorch l1_loss module's forward.

    inp, out: (N, C, H, W);  denorm: (C,) == 2*(M-m)
    returns:  scalar float32 = mean |inp*denorm - out*denorm|
    """
    N, C, H, W = inp.shape
    HW = H * W
    R = N * C
    numel = N * C * H * W
    itemsize = jnp.dtype(inp.dtype).itemsize

    # Metadata-only reshapes; no padded copies in HBM.
    x2 = inp.reshape(R, HW)
    y2 = out.reshape(R, HW)

    # ---- generation-aware tile budget / VMEM limit ------------------------
    vmem_cap = _vmem_capacity_bytes()
    if vmem_cap >= (96 << 20):          # v5e / v6e: 128 MiB physical VMEM
        default_budget = 12 << 20
        vmem_clamp = 96 << 20
        want_long_grid = False          # single TensorCore per chip
    else:                               # v7x (64 MiB) or unknown -> stay safe
        default_budget = 8 << 20
        vmem_clamp = 56 << 20
        want_long_grid = True           # two TensorCores share the grid
    tile_budget = int(tile_budget_bytes) if tile_budget_bytes else default_budget

    # ---- tiling -----------------------------------------------------------
    row_bytes = HW * itemsize
    min_rows = min(R, 8)
    if min_rows * row_bytes <= tile_budget:
        # Full-width rows: block last dim == full HW (exempt from the 128
        # rule; Mosaic masks the lane tail internally).
        HW_BLK = HW
        rows_fit = max(min_rows, (tile_budget // max(1, row_bytes)) // 8 * 8)
        if rows_fit >= R:
            ROW_BLK = R                              # whole row dim, one block
        else:
            nb = _cdiv(R, rows_fit)                  # balanced blocks (x8)
            ROW_BLK = min(rows_fit, _round_up(_cdiv(R, nb), 8))
        if want_long_grid:
            # v7x: keep >= ~8 grid steps so both TensorCores stream HBM,
            # as long as each input tile stays >= ~2 MiB.
            rows_2mb = _round_up(max(1, (2 << 20) // max(1, row_bytes)), 8)
            alt = _round_up(_cdiv(R, 8), 8)
            if alt >= rows_2mb and alt < ROW_BLK:
                ROW_BLK = alt
    else:
        # Very wide rows: also split H*W so tiles stay in the roofline sweet
        # spot and under the VMEM limit on every generation.
        ROW_BLK = min(R, 8)
        HW_BLK = max(128, (tile_budget // max(1, ROW_BLK * itemsize)) // 128 * 128)
        HW_BLK = min(HW_BLK, _round_up(HW, 128))

    n_row = _cdiv(R, ROW_BLK)
    n_hw = _cdiv(HW, HW_BLK)

    tile_bytes = ROW_BLK * HW_BLK * itemsize
    # Live set: 2 inputs x 2 pipeline buffers + (tiny) output + headroom.
    vmem_limit = int(min(vmem_clamp, max(32 << 20, 4 * tile_bytes + (8 << 20))))

    kernel = functools.partial(
        _l1_rowsum_kernel, R=R, HW=HW, ROW_BLK=ROW_BLK, HW_BLK=HW_BLK, n_hw=n_hw)

    partials = pl.pallas_call(
        kernel,
        out_shape=jax.ShapeDtypeStruct((n_row, 1, ROW_BLK), jnp.float32),
        grid_spec=pltpu.PrefetchScalarGridSpec(
            num_scalar_prefetch=0,
            grid=(n_row, n_hw),
            in_specs=[
                pl.BlockSpec((ROW_BLK, HW_BLK), lambda i, j: (i, j)),
                pl.BlockSpec((ROW_BLK, HW_BLK), lambda i, j: (i, j)),
            ],
            out_specs=pl.BlockSpec((None, 1, ROW_BLK), lambda i, j: (i, 0, 0)),
        ),
        compiler_params=pltpu.CompilerParams(
            dimension_semantics=("parallel", "arbitrary"),
            vmem_limit_bytes=vmem_limit,
        ),
    )(x2, y2)

    # O(N*C) epilogue: per-row |denorm| (row r = n*C + c -> channel c = r % C).
    # |d| keeps |x*d - y*d| = |d|*|x - y| exact even for negative d.
    row_sums = partials.reshape(-1)[:R]
    d_row = jnp.abs(jnp.tile(denorm.astype(jnp.float32), (N,)))
    total = jnp.sum(row_sums * d_row)
    return (total / jnp.float32(numel)).astype(jnp.float32)


def _reference(inp, out, denorm):
    C = inp.shape[1]
    d4 = denorm.reshape(1, C, 1, 1)
    return jnp.mean(jnp.abs(inp * d4 - out * d4))


if __name__ == "__main__":
    key = jax.random.PRNGKey(0)

    def run_case(shape, case_key, tile_budget_bytes=None):
        N, C, H, W = shape
        k1, k2 = jax.random.split(case_key, 2)
        inp = jax.random.normal(k1, shape, dtype=jnp.float32)
        out = jax.random.normal(k2, shape, dtype=jnp.float32)
        m = np.linspace(-1.0, 0.5, C).astype(np.float32)
        M = np.linspace(1.0, 2.5, C).astype(np.float32)
        denorm = jnp.asarray(2.0 * (M - m))
        loss = l1_loss_pallas(inp, out, denorm,
                              tile_budget_bytes=tile_budget_bytes)
        jax.block_until_ready(loss)
        ref = _reference(inp, out, denorm)
        assert jnp.allclose(loss, ref, rtol=1e-5, atol=1e-5), (shape, loss, ref)

    keys = jax.random.split(key, 4)
    # 1) Shapes implied by the module (small, aligned).
    run_case((2, 4, 16, 16), keys[0])
    # 2) Awkward shapes: full-dim (15, 63) blocks, no padding, no masks.
    run_case((3, 5, 7, 9), keys[1])
    # 3) Forced small tile budget: multiple row blocks + trailing-row masking.
    run_case((1, 20, 4, 4), keys[2], tile_budget_bytes=512)
    # 4) Forced tiny tile budget: H*W split (lane masking + hw accumulation).
    run_case((2, 3, 9, 20), keys[3], tile_budget_bytes=512)

    print("KERNEL_OK")
</pallas_src>

<mosaic_0001>
module attributes {stable_mosaic.version = 11 : i64} {
  func.func @_l1_rowsum_kernel(%arg0: i32, %arg1: i32, %arg2: memref<8x256xf32, #tpu.memory_space<vmem>>, %arg3: memref<8x256xf32, #tpu.memory_space<vmem>>, %arg4: memref<1x1x8xf32, #tpu.memory_space<vmem>>) attributes {dimension_semantics = [#tpu.dimension_semantics<parallel>, #tpu.dimension_semantics<arbitrary>], iteration_bounds = array<i64: 1, 1>, scalar_prefetch = 0 : i64, scratch_operands = 0 : i64, tpu.core_type = #tpu.core_type<tc>, window_params = [{transform_indices = @transform_0, window_bounds = array<i64: 8, 256>}, {transform_indices = @transform_1, window_bounds = array<i64: 8, 256>}, {transform_indices = @transform_2, window_bounds = array<i64: 1, 1, 8>}]} {
    %c0 = arith.constant 0 : index
    %c0_0 = arith.constant 0 : index
    %0 = vector.load %arg2[%c0, %c0_0] : memref<8x256xf32, #tpu.memory_space<vmem>>, vector<8x256xf32>
    %c0_1 = arith.constant 0 : index
    %c0_2 = arith.constant 0 : index
    %1 = vector.load %arg3[%c0_1, %c0_2] : memref<8x256xf32, #tpu.memory_space<vmem>>, vector<8x256xf32>
    %2 = arith.subf %0, %1 : vector<8x256xf32>
    %3 = math.absf %2 : vector<8x256xf32>
    %cst = arith.constant dense<0.000000e+00> : vector<8xf32>
    %4 = vector.multi_reduction <add>, %3, %cst [1] : vector<8x256xf32> to vector<8xf32>
    %5 = vector.shape_cast %4 : vector<8xf32> to vector<1x8xf32>
    %c0_3 = arith.constant 0 : index
    %c0_4 = arith.constant 0 : index
    %c0_5 = arith.constant 0 : index
    %6 = vector.load %arg4[%c0_3, %c0_4, %c0_5] : memref<1x1x8xf32, #tpu.memory_space<vmem>>, vector<1x1x8xf32>
    %7 = vector.shape_cast %6 : vector<1x1x8xf32> to vector<1x8xf32>
    %8 = vector.shape_cast %5 : vector<1x8xf32> to vector<1x1x8xf32>
    tpu.vector_store %arg4[%c0_3, %c0_4, %c0_5], %8 {strides = array<i32>} : memref<1x1x8xf32, #tpu.memory_space<vmem>>, vector<1x1x8xf32>,
    return
  }
  func.func @transform_0(%arg0: i32, %arg1: i32) -> (i32, i32) {
    %c0_i32 = arith.constant 0 : i32
    return %arg0, %arg1 : i32, i32
  }
  func.func @transform_1(%arg0: i32, %arg1: i32) -> (i32, i32) {
    %c0_i32 = arith.constant 0 : i32
    return %arg0, %arg1 : i32, i32
  }
  func.func @transform_2(%arg0: i32, %arg1: i32) -> (i32, i32, i32) {
    %c0_i32 = arith.constant 0 : i32
    %c0_i32_0 = arith.constant 0 : i32
    %c0_i32_1 = arith.constant 0 : i32
    return %arg0, %c0_i32, %c0_i32_0 : i32, i32, i32
  }
}

</mosaic_0001>

<bundles_post_ra>
// kernel: tpu_custom_call.1
= control target key start
LH: loop header
LB: loop body
LE: loop exit
PB: predicated region body
PF: predicated region fallthrough
CT: control target
= control target key end

     0   :  { %7 = vsyncpa [#allocation3], 0  ;;  %s202_s0 = inlined_call_operand.hbm [shape: f32[8,256], index: 0, kind: input, shape index: {}]   ;;  %s203_s1 = inlined_call_operand.hbm [shape: f32[8,256], index: 1, kind: input, shape index: {}]   ;;  %s204_s2 = inlined_call_operand.hbm [shape: f32[1,1,8], index: 2, kind: output, shape index: {}]  }
   0x1   :  { %8 = vsyncpa [#allocation6], 0 }
   0x2   :  { %9 = vsyncpa [#allocation4], 0  ;;  %s148_s9 = smov [#allocation2]   ;;  %s149_s11 = smov [#allocation5]  }
   0x3   :  { %s16_s10 = sshll.u32 %s148_s9, 4  ;;  %s26_s12 = sshll.u32 %s149_s11, 4  ;;  %s17_s10 = int_to_ptr.vmem [resolvable:$true] %s16_s10  ;;  %s27_s12 = int_to_ptr.vmem [resolvable:$true] %s26_s12 }
   0x4   :  { %s76_s15 = scalar_lea.hbm %s202_s0, 256 }
   0x5   :  { %p77_p0 = scmp.ne.s32.totalorder %s202_s0, %s76_s15  ;;  %p80_p1 = scmp.lt.u32.totalorder %s76_s15, %s202_s0 }
   0x7   :  { %p82_p2 = pnand %p80_p1, %p77_p0 }
   0x9   :  { %85 = shalt.err (!%p82_p2)
}
   0xa   :  { %s86_s20 = scalar_lea.vmem %s17_s10, 256  ;;  %p91_p4 = scmp.lt.s32.totalorder %s17_s10, %s17_s10 }
   0xb   :  { %p87_p3 = scmp.ne.s32.totalorder %s17_s10, %s86_s20  ;;  %p92_p5 = scmp.lt.s32.totalorder %s86_s20, %s86_s20 }
   0xd   :  { %p93_p6 = por %p92_p5, %p91_p4 }
   0xf   :  { %p94_p7 = pnand %p93_p6, %p87_p3 }
  0x11   :  { %97 = shalt.err (!%p94_p7)
}
  0x12   :  { %19 = dma.hbm_to_vmem [thread:$0]  %s202_s0, 256, %s17_s10, [#allocation3]  }
  0x13   :  { %s98_s25 = scalar_lea.hbm %s203_s1, 256 }
  0x14   :  { %p99_p8 = scmp.ne.s32.totalorder %s203_s1, %s98_s25  ;;  %p102_p9 = scmp.lt.u32.totalorder %s98_s25, %s203_s1 }
  0x16   :  { %p104_p10 = pnand %p102_p9, %p99_p8 }
  0x18   :  { %107 = shalt.err (!%p104_p10)
}
  0x19   :  { %s108_s30 = scalar_lea.vmem %s27_s12, 256  ;;  %p113_p12 = scmp.lt.s32.totalorder %s27_s12, %s27_s12 }
  0x1a   :  { %p109_p11 = scmp.ne.s32.totalorder %s27_s12, %s108_s30  ;;  %p114_p13 = scmp.lt.s32.totalorder %s108_s30, %s108_s30 }
  0x1c   :  { %p115_p0 = por %p114_p13, %p113_p12 }
  0x1e   :  { %p116_p1 = pnand %p115_p0, %p109_p11 }
  0x20   :  { %119 = shalt.err (!%p116_p1)
}
  0x21   :  { %29 = dma.hbm_to_vmem [thread:$0]  %s203_s1, 256, %s27_s12, [#allocation6]  }
  0x22   :  { %142 = dma.done.wait [#allocation3], 256  }
  0x23   :  { %143 = vsyncadd [#allocation3], 4294967040 }
  0x24   :  { %144 = dma.done.wait [#allocation6], 256  }
  0x25   :  { %145 = vsyncadd [#allocation6], 4294967040  ;;  %v36_v0 = vld [vmem:[#allocation2] sm:$0xff]  ;;  %v37_v1 = vld [vmem:[#allocation2 + $0x8] sm:$0xff]  ;;  %v48_v9 = vlaneseq  ;;  %s150_s4 = smov [#allocation7]   ;;  %vm55_vm0 = vcmask 57344  }
  0x26   :  { %v38_v2 = vld [vmem:[#allocation5] sm:$0xff]  ;;  %v39_v3 = vld [vmem:[#allocation5 + $0x8] sm:$0xff]  ;;  %s63_s1 = sshll.u32 %s150_s4, 4  ;;  %s64_s1 = int_to_ptr.vmem [resolvable:$true] %s63_s1 }
  0x27   :  { %v40_v4 = vsub.f32 %v36_v0, %v38_v2  ;;  %v41_v5 = vsub.f32 %v37_v1, %v39_v3  ;;  %v49_v10 = vand.u32 127, %v48_v9  ;;  %v51_v11 = vshrl.u32 %v48_v9, 7  ;;  %s120_s5 = scalar_lea.vmem %s64_s1, 16  ;;  %s124_s6 = scalar_lea.vmem %s64_s1, 32 }
  0x28   :  { %p121_p2 = scmp.ne.s32.totalorder %s64_s1, %s120_s5  ;;  %p125_p3 = scmp.lt.s32.totalorder %s64_s1, %s64_s1 }
  0x29   :  { %v42_v6 = vand.u32 2147483647, %v40_v4  ;;  %v43_v7 = vand.u32 2147483647, %v41_v5  ;;  %v52_v12 = vsub.s32 %v49_v10, %v51_v11  ;;  %p126_p4 = scmp.lt.s32.totalorder %s124_s6, %s120_s5 }
  0x2b   :  { %v44_v8 = vadd.f32 %v43_v7, %v42_v6  ;;  %p127_p5 = por %p126_p4, %p125_p3 }
  0x2d   :  { %45 = vadd.xlane.f32.xlu0 %v44_v8  ;;  %p128_p6 = pnand %p127_p5, %p121_p2 }
  0xba   :  { %v46_v13 = vpop.xlane.xlu0 %45 }
  0xbb   :  { %v53_v14 = vrot.slane %v46_v13, %v52_v12 }
  0xbd   :  { %56 = vst.msk [vmem:[#allocation7] sm:$0x1] %vm55_vm0, %v53_v14 }
  0xbe   :  { %131 = shalt.err (!%p128_p6)
}
  0xbf   :  { %s132_s9 = scalar_lea.hbm %s204_s2, 16 }
  0xc0   :  { %p133_p7 = scmp.ne.s32.totalorder %s204_s2, %s132_s9  ;;  %p136_p8 = scmp.lt.u32.totalorder %s132_s9, %s204_s2 }
  0xc2   :  { %p138_p9 = pnand %p136_p8, %p133_p7 }
  0xc4   :  { %141 = shalt.err (!%p138_p9)
}
  0xc5   :  { %66 = dma.vmem_to_hbm [thread:$0]  %s64_s1, 16, %s204_s2, [#allocation4]  }
  0xc6   :  { %146 = dma.done.wait [#allocation4], 16  }
  0xc7   :  { %147 = vsyncadd [#allocation4], 4294967280 }
  0xc8   :  { %70 = vsyncpa [#allocation3], 1 }
  0xc9   :  { %71 = vsyncpa [#allocation6], 1 }
  0xca   :  { %72 = vsyncpa [#allocation4], 1 }

</bundles_post_ra>
